<compile_context>
chip_gen: v7x
topology: tpu7x:2x2x1
jax: 0.10.0
libtpu: 0.0.40
codegen_flags: <defaults>
</compile_context>

<pallas_src>
import functools

import jax
import jax.numpy as jnp
from jax import lax
from jax.experimental import pallas as pl
from jax.experimental.pallas import tpu as pltpu

_LANES = 128
_ACC_SUBLANES = 8        # accumulator tile rows (one f32 vreg: 8 x 128)
_CHUNK_ROWS = 512        # in-kernel accumulation chunk (rows); bounds VMEM temps


def _round_up(x, m):
    return (x + m - 1) // m * m


def _cdiv(a, b):
    return -(-a // b)


@functools.lru_cache(maxsize=None)
def _hw_config():
    """Generation-aware (trace-time static) tiling configuration."""
    try:
        kind = jax.devices()[0].device_kind.lower()
    except Exception:
        kind = ""
    if "v7" in kind:
        # v7x: 2 TensorCores, 64 MiB VMEM, ~3.2 TB/s HBM -> bigger steps +
        # a real 2-core split, but keep the footprint well under 64 MiB.
        return {"nsplit": 2, "block_bytes": 4 << 20, "vmem_limit": 40 << 20}
    # v5e / v6e: single TensorCore, 128 MiB physical VMEM.
    return {"nsplit": 1, "block_bytes": 8 << 20, "vmem_limit": 64 << 20}


def _plan(rows, itemsizes, cfg):
    """Pick (nsplit, tiles_per_split, block_rows); all static Python ints."""
    # Dtype-dependent sublane multiple: 8 (4-byte), 16 (2-byte), 32 (1-byte).
    s = max(8, 32 // min(itemsizes))
    budget_rows = cfg["block_bytes"] // (_LANES * max(itemsizes))
    budget_rows = max(s, (budget_rows // s) * s)

    if cfg["nsplit"] == 2:
        # Derive block_rows from the split so the grid tiles the rows exactly:
        # no clamped duplicate block, every block start is in-bounds.
        half = _cdiv(rows, 2)
        tiles_per_split = _cdiv(half, budget_rows)
        block_rows = _round_up(_cdiv(half, tiles_per_split), s)
        if (2 * tiles_per_split - 1) * block_rows < rows:
            return 2, tiles_per_split, block_rows
        # Too few rows for a useful 2-way split -> fall through to 1 split.

    block_rows = min(budget_rows, _round_up(rows, s))
    return 1, _cdiv(rows, block_rows), block_rows


def _dice_partials_kernel(x_ref, t_ref, o_ref, *, block_rows, rows, need_mask):
    split = pl.program_id(0)
    step = pl.program_id(1)

    # Zero this split's partial-sum block once; it stays VMEM-resident across
    # the inner reduction axis.
    @pl.when(step == 0)
    def _():
        o_ref[...] = jnp.zeros(o_ref.shape, o_ref.dtype)

    blk = split * pl.num_programs(1) + step
    row0 = blk * block_rows            # first global row of this block

    def add_chunk(carry, chunk_row0, nrows):
        acc_i, acc_s = carry
        x = x_ref[pl.ds(chunk_row0, nrows), :].astype(jnp.float32)
        t = t_ref[pl.ds(chunk_row0, nrows), :].astype(jnp.float32)
        if need_mask:
            rid = (row0 + chunk_row0) + lax.broadcasted_iota(
                jnp.int32, (nrows, _LANES), 0)
            valid = rid < rows
            x = jnp.where(valid, x, 0.0)
            t = jnp.where(valid, t, 0.0)
        # Pure VALU: sum row-groups of the chunk into (8, 128) vreg-shaped
        # accumulators (intersection and sum(x)+sum(t) = sum(x+t)).
        acc_i = acc_i + (x * t).reshape(-1, _ACC_SUBLANES, _LANES).sum(axis=0)
        acc_s = acc_s + (x + t).reshape(-1, _ACC_SUBLANES, _LANES).sum(axis=0)
        return acc_i, acc_s

    zeros = jnp.zeros((_ACC_SUBLANES, _LANES), jnp.float32)
    carry = (zeros, zeros)

    nfull = block_rows // _CHUNK_ROWS
    rem = block_rows % _CHUNK_ROWS       # multiple of the sublane count

    if nfull > 0:
        def body(j, c):
            start = pl.multiple_of(j * _CHUNK_ROWS, _CHUNK_ROWS)
            return add_chunk(c, start, _CHUNK_ROWS)
        carry = lax.fori_loop(0, nfull, body, carry)
    if rem > 0:
        carry = add_chunk(carry, nfull * _CHUNK_ROWS, rem)

    o_ref[0, 0] += carry[0]
    o_ref[0, 1] += carry[1]


def dice_loss(inputs, targets, smooth=1e-07):
    """Pallas TPU implementation of DiceLoss.forward."""
    x = jnp.ravel(inputs)
    t = jnp.ravel(targets)
    n = x.shape[0]
    if n == 0:
        # intersection = sums = 0  ->  dice = smooth/smooth = 1  ->  loss = 0
        return jnp.float32(0.0)

    def _norm(a):
        if a.dtype in (jnp.float32, jnp.bfloat16):
            return a
        return a.astype(jnp.float32)

    x = _norm(x)
    t = _norm(t)

    # Aligned sizes (n % 128 == 0): the reshape is a bitcast -> zero extra HBM
    # traffic outside the kernel.
    pad = (-n) % _LANES
    if pad:
        # TODO(synk): a fully copy-free sub-128 tail would need 1-D block /
        # in-kernel relayout support; pad only the <128-element remainder.
        x = jnp.pad(x, (0, pad))
        t = jnp.pad(t, (0, pad))
    rows = (n + pad) // _LANES
    x2 = x.reshape(rows, _LANES)
    t2 = t.reshape(rows, _LANES)

    cfg = _hw_config()
    itemsizes = (x2.dtype.itemsize, t2.dtype.itemsize)
    nsplit, tiles_per_split, block_rows = _plan(rows, itemsizes, cfg)
    # Only the final (genuine tail) block can be partial; mask only if needed.
    need_mask = nsplit * tiles_per_split * block_rows > rows

    kernel = functools.partial(
        _dice_partials_kernel,
        block_rows=block_rows, rows=rows, need_mask=need_mask)

    def in_map(c, i):
        return (c * tiles_per_split + i, 0)

    def _run(dims):
        return pl.pallas_call(
            kernel,
            out_shape=jax.ShapeDtypeStruct(
                (nsplit, 2, _ACC_SUBLANES, _LANES), jnp.float32),
            grid_spec=pltpu.PrefetchScalarGridSpec(
                num_scalar_prefetch=0,
                grid=(nsplit, tiles_per_split),
                in_specs=[
                    pl.BlockSpec((block_rows, _LANES), in_map),
                    pl.BlockSpec((block_rows, _LANES), in_map),
                ],
                out_specs=pl.BlockSpec(
                    (1, 2, _ACC_SUBLANES, _LANES), lambda c, i: (c, 0, 0, 0)),
            ),
            compiler_params=pltpu.CompilerParams(
                dimension_semantics=dims,
                vmem_limit_bytes=cfg["vmem_limit"],
            ),
        )(x2, t2)

    if nsplit == 2:
        # v7x: land the two splits on the two TensorCores.
        try:
            parts = _run((pltpu.CORE_PARALLEL, pltpu.ARBITRARY))
        except Exception:
            parts = _run(("parallel", "arbitrary"))
    else:
        parts = _run(("arbitrary", "arbitrary"))

    # Tiny final combine (8 KiB per split) + dice formula in plain JAX.
    intersection = jnp.sum(parts[:, 0])
    total = jnp.sum(parts[:, 1])
    smooth = jnp.asarray(smooth, jnp.float32)
    dice = (2.0 * intersection + smooth) / (total + smooth)
    return 1.0 - dice


def dice_loss_ref(inputs, targets, smooth=1e-07):
    x = jnp.reshape(inputs, (-1,)).astype(jnp.float32)
    t = jnp.reshape(targets, (-1,)).astype(jnp.float32)
    intersection = jnp.sum(x * t)
    dice = (2.0 * intersection + smooth) / (jnp.sum(x) + jnp.sum(t) + smooth)
    return 1.0 - dice


if __name__ == "__main__":
    key = jax.random.PRNGKey(0)

    def _check(shape):
        k1, k2 = jax.random.split(jax.random.fold_in(key, shape[-1]))
        inputs = jax.nn.sigmoid(jax.random.normal(k1, shape, jnp.float32))
        targets = (jax.random.uniform(k2, shape) > 0.5).astype(jnp.float32)
        loss = jax.block_until_ready(dice_loss(inputs, targets))
        ref = jax.block_until_ready(dice_loss_ref(inputs, targets))
        assert jnp.allclose(loss, ref, rtol=1e-5, atol=1e-6), (shape, loss, ref)

    # Primary small NCHW case: batch=2, channels=4, spatial=16x16 (aligned,
    # zero-copy wrapper path).
    _check((2, 4, 16, 16))
    # Unaligned tail (exercises the sub-128 pad + in-kernel row mask).
    _check((3, 5, 17, 19))
    # Multiple in-kernel chunks / split path (exercises fori_loop + remainder).
    _check((4, 8, 128, 130))

    print("KERNEL_OK")
</pallas_src>

<mosaic_0001>
module attributes {stable_mosaic.version = 11 : i64} {
  func.func @_dice_partials_kernel(%arg0: i32, %arg1: i32, %arg2: memref<16x128xf32, #tpu.memory_space<vmem>>, %arg3: memref<16x128xf32, #tpu.memory_space<vmem>>, %arg4: memref<1x2x8x128xf32, #tpu.memory_space<vmem>>) attributes {dimension_semantics = [#tpu.dimension_semantics<arbitrary>, #tpu.dimension_semantics<arbitrary>], iteration_bounds = array<i64: 1, 1>, scalar_prefetch = 0 : i64, scratch_operands = 0 : i64, tpu.core_type = #tpu.core_type<tc>, window_params = [{transform_indices = @transform_0, window_bounds = array<i64: 16, 128>}, {transform_indices = @transform_1, window_bounds = array<i64: 16, 128>}, {transform_indices = @transform_2, window_bounds = array<i64: 1, 2, 8, 128>}]} {
    %c0_i32 = arith.constant 0 : i32
    %0 = arith.cmpi eq, %arg1, %c0_i32 : i32
    %1 = arith.extui %0 : i1 to i32
    %c0_i32_0 = arith.constant 0 : i32
    %2 = arith.cmpi ne, %1, %c0_i32_0 : i32
    scf.if %2 {
      %cst_21 = arith.constant 0.000000e+00 : f32
      %26 = vector.broadcast %cst_21 : f32 to vector<1x2x8x128xf32>
      %c0_22 = arith.constant 0 : index
      %c0_23 = arith.constant 0 : index
      %c0_24 = arith.constant 0 : index
      %c0_25 = arith.constant 0 : index
      %27 = vector.load %arg4[%c0_22, %c0_23, %c0_24, %c0_25] : memref<1x2x8x128xf32, #tpu.memory_space<vmem>>, vector<1x2x8x128xf32>
      tpu.vector_store %arg4[%c0_22, %c0_23, %c0_24, %c0_25], %26 {strides = array<i32>} : memref<1x2x8x128xf32, #tpu.memory_space<vmem>>, vector<1x2x8x128xf32>,
    } else {
    }
    %cst = arith.constant 0.000000e+00 : f32
    %3 = vector.broadcast %cst : f32 to vector<8x128xf32>
    %c0 = arith.constant 0 : index
    %c0_1 = arith.constant 0 : index
    %4 = vector.load %arg2[%c0, %c0_1] : memref<16x128xf32, #tpu.memory_space<vmem>>, vector<16x128xf32>
    %c0_2 = arith.constant 0 : index
    %c0_3 = arith.constant 0 : index
    %5 = vector.load %arg3[%c0_2, %c0_3] : memref<16x128xf32, #tpu.memory_space<vmem>>, vector<16x128xf32>
    %6 = arith.mulf %4, %5 : vector<16x128xf32>
    %7 = vector.shape_cast %6 : vector<16x128xf32> to vector<2x8x128xf32>
    %cst_4 = arith.constant dense<0.000000e+00> : vector<8x128xf32>
    %8 = vector.multi_reduction <add>, %7, %cst_4 [0] : vector<2x8x128xf32> to vector<8x128xf32>
    %9 = arith.addf %3, %8 : vector<8x128xf32>
    %10 = arith.addf %4, %5 : vector<16x128xf32>
    %11 = vector.shape_cast %10 : vector<16x128xf32> to vector<2x8x128xf32>
    %cst_5 = arith.constant dense<0.000000e+00> : vector<8x128xf32>
    %12 = vector.multi_reduction <add>, %11, %cst_5 [0] : vector<2x8x128xf32> to vector<8x128xf32>
    %13 = arith.addf %3, %12 : vector<8x128xf32>
    %c0_6 = arith.constant 0 : index
    %c0_7 = arith.constant 0 : index
    %c0_8 = arith.constant 0 : index
    %c0_9 = arith.constant 0 : index
    %14 = vector.load %arg4[%c0_6, %c0_7, %c0_8, %c0_9] : memref<1x2x8x128xf32, #tpu.memory_space<vmem>>, vector<1x1x8x128xf32>
    %15 = vector.shape_cast %14 : vector<1x1x8x128xf32> to vector<8x128xf32>
    %16 = arith.addf %15, %9 : vector<8x128xf32>
    %c0_10 = arith.constant 0 : index
    %c0_11 = arith.constant 0 : index
    %c0_12 = arith.constant 0 : index
    %c0_13 = arith.constant 0 : index
    %17 = vector.load %arg4[%c0_10, %c0_11, %c0_12, %c0_13] : memref<1x2x8x128xf32, #tpu.memory_space<vmem>>, vector<1x1x8x128xf32>
    %18 = vector.shape_cast %17 : vector<1x1x8x128xf32> to vector<8x128xf32>
    %19 = vector.shape_cast %16 : vector<8x128xf32> to vector<1x1x8x128xf32>
    tpu.vector_store %arg4[%c0_10, %c0_11, %c0_12, %c0_13], %19 {strides = array<i32>} : memref<1x2x8x128xf32, #tpu.memory_space<vmem>>, vector<1x1x8x128xf32>,
    %c0_14 = arith.constant 0 : index
    %c1 = arith.constant 1 : index
    %c0_15 = arith.constant 0 : index
    %c0_16 = arith.constant 0 : index
    %20 = vector.load %arg4[%c0_14, %c1, %c0_15, %c0_16] : memref<1x2x8x128xf32, #tpu.memory_space<vmem>>, vector<1x1x8x128xf32>
    %21 = vector.shape_cast %20 : vector<1x1x8x128xf32> to vector<8x128xf32>
    %22 = arith.addf %21, %13 : vector<8x128xf32>
    %c0_17 = arith.constant 0 : index
    %c1_18 = arith.constant 1 : index
    %c0_19 = arith.constant 0 : index
    %c0_20 = arith.constant 0 : index
    %23 = vector.load %arg4[%c0_17, %c1_18, %c0_19, %c0_20] : memref<1x2x8x128xf32, #tpu.memory_space<vmem>>, vector<1x1x8x128xf32>
    %24 = vector.shape_cast %23 : vector<1x1x8x128xf32> to vector<8x128xf32>
    %25 = vector.shape_cast %22 : vector<8x128xf32> to vector<1x1x8x128xf32>
    tpu.vector_store %arg4[%c0_17, %c1_18, %c0_19, %c0_20], %25 {strides = array<i32>} : memref<1x2x8x128xf32, #tpu.memory_space<vmem>>, vector<1x1x8x128xf32>,
    return
  }
  func.func @transform_0(%arg0: i32, %arg1: i32) -> (i32, i32) {
    %c1_i32 = arith.constant 1 : i32
    %0 = arith.muli %arg0, %c1_i32 : i32
    %1 = arith.addi %0, %arg1 : i32
    %c0_i32 = arith.constant 0 : i32
    %c0_i32_0 = arith.constant 0 : i32
    return %1, %c0_i32 : i32, i32
  }
  func.func @transform_1(%arg0: i32, %arg1: i32) -> (i32, i32) {
    %c1_i32 = arith.constant 1 : i32
    %0 = arith.muli %arg0, %c1_i32 : i32
    %1 = arith.addi %0, %arg1 : i32
    %c0_i32 = arith.constant 0 : i32
    %c0_i32_0 = arith.constant 0 : i32
    return %1, %c0_i32 : i32, i32
  }
  func.func @transform_2(%arg0: i32, %arg1: i32) -> (i32, i32, i32, i32) {
    %c0_i32 = arith.constant 0 : i32
    %c0_i32_0 = arith.constant 0 : i32
    %c0_i32_1 = arith.constant 0 : i32
    %c0_i32_2 = arith.constant 0 : i32
    return %arg0, %c0_i32, %c0_i32_0, %c0_i32_1 : i32, i32, i32, i32
  }
}

</mosaic_0001>

<bundles_post_ra>
// kernel: tpu_custom_call.1
= control target key start
LH: loop header
LB: loop body
LE: loop exit
PB: predicated region body
PF: predicated region fallthrough
CT: control target
= control target key end

     0   :  { %7 = vsyncpa [#allocation3], 0  ;;  %s238_s0 = inlined_call_operand.hbm [shape: f32[16,128], index: 0, kind: input, shape index: {}]   ;;  %s239_s1 = inlined_call_operand.hbm [shape: f32[16,128], index: 1, kind: input, shape index: {}]   ;;  %s240_s2 = inlined_call_operand.hbm [shape: f32[1,2,8,128], index: 2, kind: output, shape index: {}]  }
   0x1   :  { %8 = vsyncpa [#allocation6], 0 }
   0x2   :  { %9 = vsyncpa [#allocation4], 0  ;;  %s173_s9 = smov [#allocation2]   ;;  %s101_s13 = scalar_lea.hbm %s238_s0, 256 }
   0x3   :  { %s19_s10 = sshll.u32 %s173_s9, 4  ;;  %p102_p0 = scmp.ne.s32.totalorder %s238_s0, %s101_s13  ;;  %s20_s10 = int_to_ptr.vmem [resolvable:$true] %s19_s10 }
   0x4   :  { %p105_p1 = scmp.lt.u32.totalorder %s101_s13, %s238_s0 }
   0x6   :  { %p107_p2 = pnand %p105_p1, %p102_p0 }
   0x8   :  { %110 = shalt.err (!%p107_p2)
}
   0x9   :  { %s111_s18 = scalar_lea.vmem %s20_s10, 256  ;;  %p116_p4 = scmp.lt.s32.totalorder %s20_s10, %s20_s10 }
   0xa   :  { %p112_p3 = scmp.ne.s32.totalorder %s20_s10, %s111_s18  ;;  %p117_p5 = scmp.lt.s32.totalorder %s111_s18, %s111_s18 }
   0xc   :  { %p118_p6 = por %p117_p5, %p116_p4 }
   0xe   :  { %p119_p7 = pnand %p118_p6, %p112_p3 }
  0x10   :  { %122 = shalt.err (!%p119_p7)
}
  0x11   :  { %s174_s19 = smov 128   ;;  %s175_s20 = smov 8  }
  0x12   :  { %25 = dma.hbm_to_vmem [thread:$0]  %s238_s0, 256, %s20_s10, [#allocation3], %s174_s19, %s174_s19, %s175_s20  }
  0x13   :  { %s176_s23 = smov [#allocation5]   ;;  %s123_s27 = scalar_lea.hbm %s239_s1, 256 }
  0x14   :  { %s35_s24 = sshll.u32 %s176_s23, 4  ;;  %p124_p8 = scmp.ne.s32.totalorder %s239_s1, %s123_s27  ;;  %s36_s24 = int_to_ptr.vmem [resolvable:$true] %s35_s24 }
  0x15   :  { %p127_p9 = scmp.lt.u32.totalorder %s123_s27, %s239_s1 }
  0x17   :  { %p129_p10 = pnand %p127_p9, %p124_p8 }
  0x19   :  { %132 = shalt.err (!%p129_p10)
}
  0x1a   :  { %s133_s4 = scalar_lea.vmem %s36_s24, 256  ;;  %p138_p12 = scmp.lt.s32.totalorder %s36_s24, %s36_s24 }
  0x1b   :  { %p134_p11 = scmp.ne.s32.totalorder %s36_s24, %s133_s4  ;;  %p139_p13 = scmp.lt.s32.totalorder %s133_s4, %s133_s4 }
  0x1d   :  { %p140_p0 = por %p139_p13, %p138_p12 }
  0x1f   :  { %p141_p1 = pnand %p140_p0, %p134_p11 }
  0x21   :  { %144 = shalt.err (!%p141_p1)
}
  0x22   :  { %41 = dma.hbm_to_vmem [thread:$0]  %s239_s1, 256, %s36_s24, [#allocation6], %s174_s19, %s174_s19, %s175_s20  }
  0x23   :  { %167 = dma.done.wait [#allocation3], 256  }
  0x24   :  { %168 = vsyncadd [#allocation3], 4294967040 }
  0x25   :  { %169 = dma.done.wait [#allocation6], 256  }
  0x26   :  { %170 = vsyncadd [#allocation6], 4294967040  ;;  %v58_v0 = vld [vmem:[#allocation2] sm:$0xff]  ;;  %v59_v1 = vld [vmem:[#allocation2 + $0x8] sm:$0xff]  ;;  %s177_s6 = smov [#allocation7]  }
  0x27   :  { %v60_v2 = vld [vmem:[#allocation5] sm:$0xff]  ;;  %v61_v3 = vld [vmem:[#allocation5 + $0x8] sm:$0xff]  ;;  %s82_s7 = sshll.u32 %s177_s6, 4  ;;  %s83_s7 = int_to_ptr.vmem [resolvable:$true] %s82_s7 }
  0x28   :  { %v62_v4 = vmul.f32 %v60_v2, %v58_v0  ;;  %v66_v5 = vadd.f32 %v60_v2, %v58_v0  ;;  %v63_v6 = vmul.f32 %v61_v3, %v59_v1  ;;  %v67_v7 = vadd.f32 %v61_v3, %v59_v1  ;;  %s145_s1 = scalar_lea.vmem %s83_s7, 256  ;;  %p150_p3 = scmp.lt.s32.totalorder %s83_s7, %s83_s7 }
  0x29   :  { %p146_p2 = scmp.ne.s32.totalorder %s83_s7, %s145_s1  ;;  %p151_p4 = scmp.lt.s32.totalorder %s145_s1, %s145_s1 }
  0x2a   :  { %v64_v8 = vadd.f32 %v63_v6, %v62_v4  ;;  %v68_v9 = vadd.f32 %v67_v7, %v66_v5 }
  0x2b   :  { %p152_p5 = por %p151_p4, %p150_p3 }
  0x2c   :  { %72 = vst [vmem:[#allocation7] sm:$0xff] %v64_v8  ;;  %76 = vst [vmem:[#allocation7 + $0x8] sm:$0xff] %v68_v9 }
  0x2d   :  { %p153_p6 = pnand %p152_p5, %p146_p2 }
  0x2f   :  { %156 = shalt.err (!%p153_p6)
}
  0x30   :  { %s157_s10 = scalar_lea.hbm %s240_s2, 256 }
  0x31   :  { %p158_p7 = scmp.ne.s32.totalorder %s240_s2, %s157_s10  ;;  %p161_p8 = scmp.lt.u32.totalorder %s157_s10, %s240_s2 }
  0x33   :  { %p163_p9 = pnand %p161_p8, %p158_p7 }
  0x35   :  { %166 = shalt.err (!%p163_p9)
}
  0x36   :  { %88 = dma.vmem_to_hbm [thread:$0]  %s83_s7, 256, %s240_s2, [#allocation4], %s174_s19, %s174_s19, %s175_s20  }
  0x37   :  { %171 = dma.done.wait [#allocation4], 256  }
  0x38   :  { %172 = vsyncadd [#allocation4], 4294967040 }
  0x39   :  { %92 = vsyncpa [#allocation3], 1 }
  0x3a   :  { %93 = vsyncpa [#allocation6], 1 }
  0x3b   :  { %94 = vsyncpa [#allocation4], 1 }

</bundles_post_ra>
